<compile_context>
chip_gen: v6e
topology: v6e:2x2x1
jax: 0.10.0
libtpu: 0.0.40
codegen_flags: <defaults>
</compile_context>

<pallas_src>
import functools
import math

import jax
import jax.numpy as jnp
from jax.experimental import pallas as pl
from jax.experimental.pallas import tpu as pltpu


def _round_up(x, m):
    return ((x + m - 1) // m) * m


def _cdiv(a, b):
    return (a + b - 1) // b


def _vmem_capacity_bytes():
    try:
        info = pltpu.get_tpu_info()
        cap = getattr(info, "vmem_capacity_bytes", None)
        if cap:
            return int(cap)
    except Exception:
        pass
    return 64 * 1024 * 1024  # conservative default (v7x per-TC VMEM)


def _gelu(h, approximate):
    if approximate:
        # tanh form -> EUP tanh slot (nearly free on v6e/v7x). Slightly different
        # numerics from torch.nn.GELU() default; opt-in only.
        c = jnp.float32(math.sqrt(2.0 / math.pi))
        return 0.5 * h * (1.0 + jnp.tanh(c * (h + jnp.float32(0.044715) * h * h * h)))
    # exact erf GELU in f32 — matches torch.nn.GELU() default.
    return 0.5 * h * (1.0 + jax.lax.erf(h * jnp.float32(1.0 / math.sqrt(2.0))))


# --------------------------------------------------------------------------- #
# Kernels
# --------------------------------------------------------------------------- #
def _mlp_kernel_resident(x_ref, w1_ref, b1_ref, w2_ref, b2_ref, o_ref,
                         *, matmul_dtype, approximate_gelu):
    """Full (D,H)/(H,D) weights resident in VMEM; grid = (M_tiles,)."""
    x = x_ref[...].astype(matmul_dtype)
    h = jnp.dot(x, w1_ref[...], preferred_element_type=jnp.float32) + b1_ref[...]
    h = _gelu(h, approximate_gelu)
    out = jnp.dot(h.astype(matmul_dtype), w2_ref[...],
                  preferred_element_type=jnp.float32)
    # dropout: identity (eval mode / p == 0.0)
    # TODO(synk): training-mode dropout via pltpu.prng_seed/prng_random_bits.
    o_ref[...] = (out + b2_ref[...]).astype(o_ref.dtype)


def _mlp_kernel_htiled_f32out(x_ref, w1_ref, b1_ref, w2_ref, b2_ref, o_ref,
                              *, matmul_dtype, approximate_gelu):
    """H-tiled path, f32 output: accumulate directly into the resident out block."""
    h_idx = pl.program_id(1)

    @pl.when(h_idx == 0)
    def _():
        o_ref[...] = jnp.zeros_like(o_ref)

    x = x_ref[...].astype(matmul_dtype)
    h = jnp.dot(x, w1_ref[...], preferred_element_type=jnp.float32) + b1_ref[...]
    h = _gelu(h, approximate_gelu)
    o_ref[...] += jnp.dot(h.astype(matmul_dtype), w2_ref[...],
                          preferred_element_type=jnp.float32)

    @pl.when(h_idx == pl.num_programs(1) - 1)
    def _():
        o_ref[...] += b2_ref[...]


def _mlp_kernel_htiled_acc(x_ref, w1_ref, b1_ref, w2_ref, b2_ref, o_ref, acc_ref,
                           *, matmul_dtype, approximate_gelu):
    """H-tiled path, non-f32 output: f32 VMEM accumulator scratch."""
    h_idx = pl.program_id(1)

    @pl.when(h_idx == 0)
    def _():
        acc_ref[...] = jnp.zeros_like(acc_ref)

    x = x_ref[...].astype(matmul_dtype)
    h = jnp.dot(x, w1_ref[...], preferred_element_type=jnp.float32) + b1_ref[...]
    h = _gelu(h, approximate_gelu)
    acc_ref[...] += jnp.dot(h.astype(matmul_dtype), w2_ref[...],
                            preferred_element_type=jnp.float32)

    @pl.when(h_idx == pl.num_programs(1) - 1)
    def _():
        o_ref[...] = (acc_ref[...] + b2_ref[...]).astype(o_ref.dtype)


# --------------------------------------------------------------------------- #
# Parameter preparation (do ONCE at init, not per forward step)
# --------------------------------------------------------------------------- #
def prepare_mlp_params(w1, b1, w2, b2, *, matmul_dtype=jnp.bfloat16, th=512,
                       weight_resident=None):
    """Pad to lane-dense shapes + cast weights to the MXU dtype, once.

    w1: (D, H), w2: (H, D)  (in_features, out_features — already W^T vs PyTorch).
    b1: (H,) or None, b2: (D,) or None.
    """
    D, H = w1.shape
    assert w2.shape == (H, D), (w1.shape, w2.shape)
    if b1 is None:
        b1 = jnp.zeros((H,), jnp.float32)
    if b2 is None:
        b2 = jnp.zeros((D,), jnp.float32)

    bpe = jnp.dtype(matmul_dtype).itemsize
    D_pad = _round_up(D, 128)
    H_128 = _round_up(H, 128)

    vmem_cap = _vmem_capacity_bytes()
    if weight_resident is None:
        # Resident iff (double-buffer-budgeted) weights use <= ~35% of VMEM.
        weight_resident = 2 * (2 * D_pad * H_128 * bpe) <= int(0.35 * vmem_cap)

    if weight_resident:
        H_pad = H_128
        th_eff = H_pad
    else:
        th_eff = min(_round_up(th, 128), H_128)
        n_h = _cdiv(H_128, th_eff)
        th_eff = _round_up(_cdiv(H_128, n_h), 128)
        H_pad = n_h * th_eff

    w1p = jnp.asarray(w1, jnp.float32)
    w2p = jnp.asarray(w2, jnp.float32)
    b1p = jnp.asarray(b1, jnp.float32).reshape(1, H)
    b2p = jnp.asarray(b2, jnp.float32).reshape(1, D)
    if D_pad != D or H_pad != H:
        w1p = jnp.pad(w1p, ((0, D_pad - D), (0, H_pad - H)))
        w2p = jnp.pad(w2p, ((0, H_pad - H), (0, D_pad - D)))
        b1p = jnp.pad(b1p, ((0, 0), (0, H_pad - H)))
        b2p = jnp.pad(b2p, ((0, 0), (0, D_pad - D)))
    w1p = w1p.astype(matmul_dtype)
    w2p = w2p.astype(matmul_dtype)

    return dict(w1=w1p, b1=b1p, w2=w2p, b2=b2p,
                D=D, H=H, D_pad=D_pad, H_pad=H_pad, th=th_eff,
                matmul_dtype=matmul_dtype, weight_resident=bool(weight_resident))


# --------------------------------------------------------------------------- #
# Forward pass
# --------------------------------------------------------------------------- #
def mlp_pallas_apply(x, params, *, tm=1024, approximate_gelu=False):
    """gelu(x @ W1 + b1) @ W2 + b2 (dropout = identity).  x: (..., D)."""
    D = params["D"]
    assert x.shape[-1] == D
    D_pad, H_pad, th = params["D_pad"], params["H_pad"], params["th"]
    matmul_dtype = params["matmul_dtype"]
    resident = params["weight_resident"]
    w1, b1, w2, b2 = params["w1"], params["b1"], params["w2"], params["b2"]

    out_dtype = x.dtype
    lead_shape = x.shape[:-1]
    M = int(math.prod(lead_shape)) if lead_shape else 1
    x2 = x.reshape(M, D)

    x_bpe = jnp.dtype(x.dtype).itemsize
    out_bpe = jnp.dtype(out_dtype).itemsize
    w_bpe = jnp.dtype(matmul_dtype).itemsize
    f32_out = jnp.dtype(out_dtype) == jnp.dtype(jnp.float32)

    vmem_cap = _vmem_capacity_bytes()
    vmem_budget = int(0.80 * vmem_cap)

    th_v = H_pad if resident else th

    def vmem_need(tm_v):
        need = (
            2 * tm_v * D_pad * x_bpe            # x tile (double buffered)
            + 2 * D_pad * th_v * w_bpe          # W1 tile
            + 2 * th_v * 4                      # b1 tile
            + 2 * th_v * D_pad * w_bpe          # W2 tile
            + 2 * D_pad * 4                     # b2
            + 2 * tm_v * D_pad * out_bpe        # out tile
            + tm_v * th_v * (4 + 2)             # f32 hidden + bf16 hidden intermediates
            + tm_v * D_pad * (w_bpe + 4)        # x cast + f32 matmul partial
        )
        if (not resident) and (not f32_out):
            need += tm_v * D_pad * 4            # accumulator scratch
        return need

    # Largest M tile that fits the VMEM budget.
    tm_eff = max(16, _round_up(min(tm, M), 16))
    while tm_eff > 16 and vmem_need(tm_eff) > vmem_budget:
        tm_eff = max(16, _round_up(tm_eff // 2, 16))
    # Megacore (v7x: 2 TCs): keep >= 2 row tiles when the problem is big enough.
    if _cdiv(M, tm_eff) < 2 and M >= 512:
        tm_eff = _round_up(_cdiv(M, 2), 16)

    M_pad = _round_up(M, tm_eff)
    if M_pad != M or D_pad != D:
        x2 = jnp.pad(x2, ((0, M_pad - M), (0, D_pad - D)))

    n_m = M_pad // tm_eff

    if resident:
        grid = (n_m,)
        in_specs = [
            pl.BlockSpec((tm_eff, D_pad), lambda i: (i, 0)),     # x row tile
            pl.BlockSpec((D_pad, H_pad), lambda i: (0, 0)),      # full W1 (DMA'd once)
            pl.BlockSpec((1, H_pad), lambda i: (0, 0)),          # b1
            pl.BlockSpec((H_pad, D_pad), lambda i: (0, 0)),      # full W2 (DMA'd once)
            pl.BlockSpec((1, D_pad), lambda i: (0, 0)),          # b2
        ]
        out_specs = pl.BlockSpec((tm_eff, D_pad), lambda i: (i, 0))
        scratch_shapes = []
        kernel = functools.partial(_mlp_kernel_resident,
                                   matmul_dtype=matmul_dtype,
                                   approximate_gelu=approximate_gelu)
        dim_sem = ("parallel",)
        weight_reads = 1
    else:
        grid = (n_m, H_pad // th)
        # NOTE: if a trace shows exposed weight DMA at step boundaries, add
        # pipeline_mode=pl.Buffered(3) to the W1/W2 specs (budget the extra buffer).
        in_specs = [
            pl.BlockSpec((tm_eff, D_pad), lambda i, h: (i, 0)),  # x row tile
            pl.BlockSpec((D_pad, th), lambda i, h: (0, h)),      # W1 column tile
            pl.BlockSpec((1, th), lambda i, h: (0, h)),          # b1 tile
            pl.BlockSpec((th, D_pad), lambda i, h: (h, 0)),      # W2 row tile
            pl.BlockSpec((1, D_pad), lambda i, h: (0, 0)),       # b2
        ]
        out_specs = pl.BlockSpec((tm_eff, D_pad), lambda i, h: (i, 0))
        if f32_out:
            scratch_shapes = []
            kernel = functools.partial(_mlp_kernel_htiled_f32out,
                                       matmul_dtype=matmul_dtype,
                                       approximate_gelu=approximate_gelu)
        else:
            scratch_shapes = [pltpu.VMEM((tm_eff, D_pad), jnp.float32)]
            kernel = functools.partial(_mlp_kernel_htiled_acc,
                                       matmul_dtype=matmul_dtype,
                                       approximate_gelu=approximate_gelu)
        dim_sem = ("parallel", "arbitrary")
        weight_reads = n_m  # weights are re-streamed once per M tile

    need = vmem_need(tm_eff)
    vmem_limit = int(min(max(2 * need, 32 * 1024 * 1024), int(0.9 * vmem_cap)))
    vmem_limit = max(vmem_limit, need)

    weight_bytes = (w1.size + w2.size) * w_bpe
    cost = pl.CostEstimate(
        flops=4 * M_pad * D_pad * H_pad,          # two (D*H)-MAC matmuls over M rows
        transcendentals=M_pad * H_pad,            # erf / tanh
        bytes_accessed=(x2.size * x_bpe
                        + weight_reads * weight_bytes
                        + b1.size * 4 + b2.size * 4
                        + M_pad * D_pad * out_bpe),
    )

    out = pl.pallas_call(
        kernel,
        out_shape=jax.ShapeDtypeStruct((M_pad, D_pad), out_dtype),
        grid_spec=pltpu.PrefetchScalarGridSpec(
            num_scalar_prefetch=0,
            grid=grid,
            in_specs=in_specs,
            out_specs=out_specs,
            scratch_shapes=scratch_shapes),
        compiler_params=pltpu.CompilerParams(
            dimension_semantics=dim_sem,
            vmem_limit_bytes=vmem_limit),
        cost_estimate=cost,
    )(x2, w1, b1, w2, b2)

    out = out[:M, :D]
    return out.reshape(x.shape)


def mlp_pallas(x, w1, b1, w2, b2, *, tm=1024, th=512, matmul_dtype=jnp.bfloat16,
               approximate_gelu=False, weight_resident=None):
    """Convenience one-shot wrapper (prefer prepare_mlp_params once + apply per step)."""
    params = prepare_mlp_params(w1, b1, w2, b2, matmul_dtype=matmul_dtype, th=th,
                                weight_resident=weight_resident)
    return mlp_pallas_apply(x, params, tm=tm, approximate_gelu=approximate_gelu)


# --------------------------------------------------------------------------- #
# Self-test
# --------------------------------------------------------------------------- #
def _reference(x, w1, b1, w2, b2):
    D = x.shape[-1]
    h = x.reshape(-1, D).astype(jnp.float32) @ w1 + b1
    h = 0.5 * h * (1.0 + jax.lax.erf(h / math.sqrt(2.0)))
    return (h @ w2 + b2).reshape(x.shape)


def _make_params(key, D, H):
    k1, kb1, k2, kb2 = jax.random.split(key, 4)
    bound1 = 1.0 / math.sqrt(D)
    w1 = jax.random.uniform(k1, (D, H), jnp.float32, -bound1, bound1)
    b1 = jax.random.uniform(kb1, (H,), jnp.float32, -bound1, bound1)
    bound2 = 1.0 / math.sqrt(H)
    w2 = jax.random.uniform(k2, (H, D), jnp.float32, -bound2, bound2)
    b2 = jax.random.uniform(kb2, (D,), jnp.float32, -bound2, bound2)
    return w1, b1, w2, b2


if __name__ == "__main__":
    key = jax.random.PRNGKey(0)
    kx1, kp1, kx2, kp2, kx3, kp3 = jax.random.split(key, 6)

    # --- Test 1: weight-resident fast path (GPTConfig-like small sizes) --------
    B, T, D = 2, 8, 32
    H = 4 * D
    x = jax.random.normal(kx1, (B, T, D), dtype=jnp.float32)
    w1, b1, w2, b2 = _make_params(kp1, D, H)
    params = prepare_mlp_params(w1, b1, w2, b2)          # once, at "init"
    y = mlp_pallas_apply(x, params)
    jax.block_until_ready(y)
    y_ref = _reference(x, w1, b1, w2, b2)
    err = float(jnp.max(jnp.abs(y - y_ref)))
    assert jnp.allclose(y, y_ref, atol=3e-2, rtol=3e-2), ("resident", err)

    # --- Test 2: forced H-tiled path, f32 output (direct o_ref accumulation) ---
    B, T, D = 2, 16, 64
    H = 4 * D
    x = jax.random.normal(kx2, (B, T, D), dtype=jnp.float32)
    w1, b1, w2, b2 = _make_params(kp2, D, H)
    params = prepare_mlp_params(w1, b1, w2, b2, th=128, weight_resident=False)
    y = mlp_pallas_apply(x, params)
    jax.block_until_ready(y)
    y_ref = _reference(x, w1, b1, w2, b2)
    err = float(jnp.max(jnp.abs(y - y_ref)))
    assert jnp.allclose(y, y_ref, atol=3e-2, rtol=3e-2), ("htiled_f32", err)

    # --- Test 3: forced H-tiled path, bf16 activations (scratch accumulator) ---
    x_bf16 = jax.random.normal(kx3, (B, T, D), dtype=jnp.float32).astype(jnp.bfloat16)
    w1, b1, w2, b2 = _make_params(kp3, D, H)
    params = prepare_mlp_params(w1, b1, w2, b2, th=128, weight_resident=False)
    y = mlp_pallas_apply(x_bf16, params)
    jax.block_until_ready(y)
    y_ref = _reference(x_bf16.astype(jnp.float32), w1, b1, w2, b2)
    err = float(jnp.max(jnp.abs(y.astype(jnp.float32) - y_ref)))
    assert jnp.allclose(y.astype(jnp.float32), y_ref, atol=1e-1, rtol=1e-1), ("htiled_bf16", err)

    print("KERNEL_OK")
</pallas_src>

<mosaic_0001>
module attributes {stable_mosaic.version = 11 : i64} {
  func.func @_mlp_kernel_resident(%arg0: i32, %arg1: memref<16x128xf32, #tpu.memory_space<vmem>>, %arg2: memref<128x128xbf16, #tpu.memory_space<vmem>>, %arg3: memref<1x128xf32, #tpu.memory_space<vmem>>, %arg4: memref<128x128xbf16, #tpu.memory_space<vmem>>, %arg5: memref<1x128xf32, #tpu.memory_space<vmem>>, %arg6: memref<16x128xf32, #tpu.memory_space<vmem>>) attributes {dimension_semantics = [#tpu.dimension_semantics<parallel>], iteration_bounds = array<i64: 1>, scalar_prefetch = 0 : i64, scratch_operands = 0 : i64, tpu.core_type = #tpu.core_type<tc>, window_params = [{transform_indices = @transform_0, window_bounds = array<i64: 16, 128>}, {pipeline_mode = #tpu.pipeline_mode<synchronous>, transform_indices = @transform_1, window_bounds = array<i64: 128, 128>}, {pipeline_mode = #tpu.pipeline_mode<synchronous>, transform_indices = @transform_2, window_bounds = array<i64: 1, 128>}, {pipeline_mode = #tpu.pipeline_mode<synchronous>, transform_indices = @transform_3, window_bounds = array<i64: 128, 128>}, {pipeline_mode = #tpu.pipeline_mode<synchronous>, transform_indices = @transform_4, window_bounds = array<i64: 1, 128>}, {transform_indices = @transform_5, window_bounds = array<i64: 16, 128>}]} {
    %c0 = arith.constant 0 : index
    %c0_0 = arith.constant 0 : index
    %0 = vector.load %arg1[%c0, %c0_0] : memref<16x128xf32, #tpu.memory_space<vmem>>, vector<16x128xf32>
    %1 = arith.truncf %0 : vector<16x128xf32> to vector<16x128xbf16>
    %c0_1 = arith.constant 0 : index
    %c0_2 = arith.constant 0 : index
    %2 = vector.load %arg2[%c0_1, %c0_2] : memref<128x128xbf16, #tpu.memory_space<vmem>>, vector<128x128xbf16>
    %cst = arith.constant dense<0.000000e+00> : vector<16x128xf32>
    %3 = tpu.matmul %1, %2, %cst {dimension_numbers = #tpu.dot_dimension_numbers<[1], [0], [0], [1], [0, 0, 1, 1], [], []>} : vector<16x128xbf16>, vector<128x128xbf16>, vector<16x128xf32> -> vector<16x128xf32>
    %c0_3 = arith.constant 0 : index
    %c0_4 = arith.constant 0 : index
    %4 = vector.load %arg3[%c0_3, %c0_4] : memref<1x128xf32, #tpu.memory_space<vmem>>, vector<1x128xf32>
    %5 = vector.broadcast %4 : vector<1x128xf32> to vector<16x128xf32>
    %6 = arith.addf %3, %5 : vector<16x128xf32>
    %cst_5 = arith.constant 5.000000e-01 : f32
    %7 = vector.broadcast %cst_5 : f32 to vector<16x128xf32>
    %8 = arith.mulf %7, %6 : vector<16x128xf32>
    %cst_6 = arith.constant 0.707106769 : f32
    %9 = vector.broadcast %cst_6 : f32 to vector<16x128xf32>
    %10 = arith.mulf %6, %9 : vector<16x128xf32>
    %11 = math.erf %10 : vector<16x128xf32>
    %cst_7 = arith.constant 1.000000e+00 : f32
    %12 = vector.broadcast %cst_7 : f32 to vector<16x128xf32>
    %13 = arith.addf %12, %11 : vector<16x128xf32>
    %14 = arith.mulf %8, %13 : vector<16x128xf32>
    %15 = arith.truncf %14 : vector<16x128xf32> to vector<16x128xbf16>
    %c0_8 = arith.constant 0 : index
    %c0_9 = arith.constant 0 : index
    %16 = vector.load %arg4[%c0_8, %c0_9] : memref<128x128xbf16, #tpu.memory_space<vmem>>, vector<128x128xbf16>
    %cst_10 = arith.constant dense<0.000000e+00> : vector<16x128xf32>
    %17 = tpu.matmul %15, %16, %cst_10 {dimension_numbers = #tpu.dot_dimension_numbers<[1], [0], [0], [1], [0, 0, 1, 1], [], []>} : vector<16x128xbf16>, vector<128x128xbf16>, vector<16x128xf32> -> vector<16x128xf32>
    %c0_11 = arith.constant 0 : index
    %c0_12 = arith.constant 0 : index
    %18 = vector.load %arg5[%c0_11, %c0_12] : memref<1x128xf32, #tpu.memory_space<vmem>>, vector<1x128xf32>
    %19 = vector.broadcast %18 : vector<1x128xf32> to vector<16x128xf32>
    %20 = arith.addf %17, %19 : vector<16x128xf32>
    %c0_13 = arith.constant 0 : index
    %c0_14 = arith.constant 0 : index
    %21 = vector.load %arg6[%c0_13, %c0_14] : memref<16x128xf32, #tpu.memory_space<vmem>>, vector<16x128xf32>
    tpu.vector_store %arg6[%c0_13, %c0_14], %20 {strides = array<i32>} : memref<16x128xf32, #tpu.memory_space<vmem>>, vector<16x128xf32>,
    return
  }
  func.func @transform_0(%arg0: i32) -> (i32, i32) {
    %c0_i32 = arith.constant 0 : i32
    %c0_i32_0 = arith.constant 0 : i32
    return %arg0, %c0_i32 : i32, i32
  }
  func.func @transform_1(%arg0: i32) -> (i32, i32) {
    %c0_i32 = arith.constant 0 : i32
    %c0_i32_0 = arith.constant 0 : i32
    %c0_i32_1 = arith.constant 0 : i32
    return %c0_i32, %c0_i32_0 : i32, i32
  }
  func.func @transform_2(%arg0: i32) -> (i32, i32) {
    %c0_i32 = arith.constant 0 : i32
    %c0_i32_0 = arith.constant 0 : i32
    %c0_i32_1 = arith.constant 0 : i32
    return %c0_i32, %c0_i32_0 : i32, i32
  }
  func.func @transform_3(%arg0: i32) -> (i32, i32) {
    %c0_i32 = arith.constant 0 : i32
    %c0_i32_0 = arith.constant 0 : i32
    %c0_i32_1 = arith.constant 0 : i32
    return %c0_i32, %c0_i32_0 : i32, i32
  }
  func.func @transform_4(%arg0: i32) -> (i32, i32) {
    %c0_i32 = arith.constant 0 : i32
    %c0_i32_0 = arith.constant 0 : i32
    %c0_i32_1 = arith.constant 0 : i32
    return %c0_i32, %c0_i32_0 : i32, i32
  }
  func.func @transform_5(%arg0: i32) -> (i32, i32) {
    %c0_i32 = arith.constant 0 : i32
    %c0_i32_0 = arith.constant 0 : i32
    return %arg0, %c0_i32 : i32, i32
  }
}

</mosaic_0001>

<bundles_post_ra>
// kernel: tpu_custom_call.1
= control target key start
LH: loop header
LB: loop body
LE: loop exit
PB: predicated region body
PF: predicated region fallthrough
CT: control target
= control target key end

     0   :  { %10 = vsyncpa [#allocation3], 0  ;;  %s577_s0 = inlined_call_operand.hbm [shape: f32[16,128], index: 0, kind: input, shape index: {}]   ;;  %s578_s1 = inlined_call_operand.hbm [shape: bf16[128,128], index: 1, kind: input, shape index: {}]   ;;  %s579_s2 = inlined_call_operand.vmem [shape: f32[1,128], index: 2, kind: input, shape index: {}]   ;;  %s580_s3 = inlined_call_operand.hbm [shape: bf16[128,128], index: 3, kind: input, shape index: {}]   ;;  %s581_s4 = inlined_call_operand.vmem [shape: f32[1,128], index: 4, kind: input, shape index: {}]   ;;  %s582_s5 = inlined_call_operand.hbm [shape: f32[16,128], index: 5, kind: output, shape index: {}]  }
   0x1   :  { %11 = vsyncpa [#allocation6], 0 }
   0x2   :  { %12 = vsyncpa [#allocation4], 0  ;;  %s513_s18 = smov [#allocation5]  }
   0x3   :  { %s30_s19 = sshll.u32 %s513_s18, 4  ;;  %s31_s19 = int_to_ptr.vmem [resolvable:$true] %s30_s19 }
   0x4   :  { %s435_s20 = scalar_lea.vmem %s31_s19, 1024  ;;  %p440_p1 = scmp.lt.s32.totalorder %s31_s19, %s31_s19 }
   0x5   :  { %p436_p0 = scmp.ne.s32.totalorder %s31_s19, %s435_s20  ;;  %p441_p2 = scmp.lt.s32.totalorder %s435_s20, %s435_s20 }
   0x7   :  { %p442_p3 = por %p441_p2, %p440_p1 }
   0x9   :  { %p443_p4 = pnand %p442_p3, %p436_p0 }
   0xb   :  { %446 = shalt.err (!%p443_p4)
}
   0xc   :  { %s514_s21 = smov 64   ;;  %s515_s22 = smov 4  }
   0xd   :  { %36 = dma.hbm_to_vmem [thread:$0]  %s578_s1, 1024, %s31_s19, [#allocation6], %s514_s21, %s514_s21, %s515_s22  }
   0xe   :  { %s516_s25 = smov [#allocation2]  }
   0xf   :  { %s18_s26 = sshll.u32 %s516_s25, 4  ;;  %s19_s26 = int_to_ptr.vmem [resolvable:$true] %s18_s26 }
  0x10   :  { %s455_s27 = scalar_lea.vmem %s19_s26, 256  ;;  %p460_p6 = scmp.lt.s32.totalorder %s19_s26, %s19_s26 }
  0x11   :  { %p456_p5 = scmp.ne.s32.totalorder %s19_s26, %s455_s27  ;;  %p461_p7 = scmp.lt.s32.totalorder %s455_s27, %s455_s27 }
  0x13   :  { %p462_p8 = por %p461_p7, %p460_p6 }
  0x15   :  { %p463_p9 = pnand %p462_p8, %p456_p5 }
  0x17   :  { %466 = shalt.err (!%p463_p9)
}
  0x18   :  { %s517_s28 = smov 128   ;;  %s518_s29 = smov 8  }
  0x19   :  { %24 = dma.hbm_to_vmem [thread:$0]  %s577_s0, 256, %s19_s26, [#allocation3], %s517_s28, %s517_s28, %s518_s29  }
  0x1a   :  { %s519_s1 = smov [#allocation7]  }
  0x1b   :  { %s44_s7 = sshll.u32 %s519_s1, 4  ;;  %s45_s7 = int_to_ptr.vmem [resolvable:$true] %s44_s7 }
  0x1c   :  { %s475_s8 = scalar_lea.vmem %s45_s7, 1024  ;;  %p480_p11 = scmp.lt.s32.totalorder %s45_s7, %s45_s7 }
  0x1d   :  { %p476_p10 = scmp.ne.s32.totalorder %s45_s7, %s475_s8  ;;  %p481_p12 = scmp.lt.s32.totalorder %s475_s8, %s475_s8 }
  0x1f   :  { %p482_p13 = por %p481_p12, %p480_p11 }
  0x21   :  { %p483_p0 = pnand %p482_p13, %p476_p10 }
  0x23   :  { %486 = shalt.err (!%p483_p0)
}
  0x24   :  { %50 = dma.hbm_to_vmem [thread:$0]  %s580_s3, 1024, %s45_s7, [#allocation6], %s514_s21, %s514_s21, %s515_s22  }
  0x25   :  { %507 = dma.done.wait [#allocation3], 256  }
  0x26   :  { %508 = vsyncadd [#allocation3], 4294967040 }
  0x27   :  { %509 = dma.done.wait [#allocation6], 2048  }
  0x28   :  { %510 = vsyncadd [#allocation6], 4294965248  ;;  %v520_v0 = vmov 0.0   ;;  %vm521_vm0 = vmmov 0   ;;  %v407_v1 = vld [vmem:[#allocation5 + $0x38] sm:$0xff]   ;;  %v408_v2 = vld [vmem:[#allocation5 + $0x30] sm:$0xff]  }
  0x29   :  { %357 = vmatprep.subr.bf16.mxu0 %v520_v0  ;;  %373 = vmatprep.mubr.msk.bf16.mxu0 %vm521_vm0, %v520_v0  ;;  %v409_v3 = vld [vmem:[#allocation5 + $0x28] sm:$0xff]   ;;  %v410_v4 = vld [vmem:[#allocation5 + $0x20] sm:$0xff]   ;;  %v415_v5 = vld [vmem:[#allocation7 + $0x38] sm:$0xff]   ;;  %s522_s12 = smov [#allocation8]  }
  0x2a   :  { %377 = vmatprep.subr.bf16.mxu1 %v520_v0  ;;  %393 = vmatprep.mubr.msk.bf16.mxu1 %vm521_vm0, %v520_v0  ;;  %v411_v6 = vld [vmem:[#allocation5 + $0x18] sm:$0xff]   ;;  %v412_v7 = vld [vmem:[#allocation5 + $0x10] sm:$0xff]   ;;  %v413_v8 = vld [vmem:[#allocation5 + $0x8] sm:$0xff]   ;;  %s308_s13 = sshll.u32 %s522_s12, 4  ;;  %s309_s13 = int_to_ptr.vmem [resolvable:$true] %s308_s13 }
  0x2b   :  { %358 = vmatpush3.bf16.msra.mxu0 %v407_v1  ;;  %378 = vmatpush3.bf16.msra.mxu1 %v415_v5  ;;  %v414_v9 = vld [vmem:[#allocation5] sm:$0xff]   ;;  %v63_v10 = vld [vmem:[#allocation2] sm:$0xff]  ;;  %v64_v11 = vld [vmem:[#allocation2 + $0x8] sm:$0xff]  ;;  %s487_s14 = scalar_lea.vmem %s309_s13, 256  ;;  %p492_p2 = scmp.lt.s32.totalorder %s309_s13, %s309_s13 }
  0x2c   :  { %359 = vmatprep.subr.bf16.mxu0 %v520_v0  ;;  %379 = vmatprep.subr.bf16.mxu1 %v520_v0  ;;  %v65_v12 = vpack.c.bf16 %v64_v11, %v63_v10  ;;  %v416_v13 = vld [vmem:[#allocation7 + $0x30] sm:$0xff]   ;;  %v417_v14 = vld [vmem:[#allocation7 + $0x28] sm:$0xff]   ;;  %v418_v15 = vld [vmem:[#allocation7 + $0x20] sm:$0xff]   ;;  %p488_p1 = scmp.ne.s32.totalorder %s309_s13, %s487_s14  ;;  %p493_p3 = scmp.lt.s32.totalorder %s487_s14, %s487_s14 }
  0x2d   :  { %v419_v16 = vld [vmem:[#allocation7 + $0x18] sm:$0xff]   ;;  %v420_v17 = vld [vmem:[#allocation7 + $0x10] sm:$0xff]   ;;  %v421_v18 = vld [vmem:[#allocation7 + $0x8] sm:$0xff]  }
  0x2e   :  { %v422_v19 = vld [vmem:[#allocation7] sm:$0xff]   ;;  %v321_v20 = vld [vmem:[%s579_s2] ss:$0 sm:$0xff]  ;;  %p494_p4 = por %p493_p3, %p492_p2 }
  0x2f   :  { %360 = vmatpush3.bf16.msra.mxu0 %v408_v2  ;;  %380 = vmatpush3.bf16.msra.mxu1 %v416_v13  ;;  %v330_v38 = vld [vmem:[%s581_s4] ss:$0 sm:$0xff] }
  0x30   :  { %361 = vmatprep.subr.bf16.mxu0 %v520_v0  ;;  %381 = vmatprep.subr.bf16.mxu1 %v520_v0  ;;  %p495_p5 = pnand %p494_p4, %p488_p1 }
  0x33   :  { %362 = vmatpush3.bf16.msra.mxu0 %v409_v3  ;;  %382 = vmatpush3.bf16.msra.mxu1 %v417_v14 }
  0x34   :  { %363 = vmatprep.subr.bf16.mxu0 %v520_v0  ;;  %383 = vmatprep.subr.bf16.mxu1 %v520_v0 }
  0x37   :  { %364 = vmatpush3.bf16.msra.mxu0 %v410_v4  ;;  %384 = vmatpush3.bf16.msra.mxu1 %v418_v15 }
  0x38   :  { %365 = vmatprep.subr.bf16.mxu0 %v520_v0  ;;  %385 = vmatprep.subr.bf16.mxu1 %v520_v0 }
  0x3b   :  { %366 = vmatpush3.bf16.msra.mxu0 %v411_v6  ;;  %386 = vmatpush3.bf16.msra.mxu1 %v419_v16 }
  0x3c   :  { %367 = vmatprep.subr.bf16.mxu0 %v520_v0  ;;  %387 = vmatprep.subr.bf16.mxu1 %v520_v0 }
  0x3f   :  { %368 = vmatpush3.bf16.msra.mxu0 %v412_v7  ;;  %388 = vmatpush3.bf16.msra.mxu1 %v420_v17 }
  0x40   :  { %369 = vmatprep.subr.bf16.mxu0 %v520_v0  ;;  %389 = vmatprep.subr.bf16.mxu1 %v520_v0 }
  0x43   :  { %370 = vmatpush3.bf16.msra.mxu0 %v413_v8  ;;  %390 = vmatpush3.bf16.msra.mxu1 %v421_v18 }
  0x44   :  { %371 = vmatprep.subr.bf16.mxu0 %v520_v0  ;;  %391 = vmatprep.subr.bf16.mxu1 %v520_v0 }
  0x47   :  { %372 = vmatpush3.bf16.msra.mxu0 %v414_v9  ;;  %392 = vmatpush3.bf16.msra.mxu1 %v422_v19 }
  0x4a   :  { %374 = vmatmul.mubr.bf16.vlgmr.msra.gmra.mxu0 %v65_v12 }
 0x10a   :  { %v171_v21 = vpop.f32.mrf.mxu0 }
 0x10b   :  { %v172_v22 = vadd.f32 %v321_v20, %v171_v21 }
 0x10c   :  { %v375_v23 = vpop.f32.mrf.mxu0 }
 0x10d   :  { %v180_v24 = vmul.f32 0.70710677, %v172_v22  ;;  %v178_v32 = vmul.f32 0.5, %v172_v22 }
 0x10e   :  { %v174_v25 = vpop.f32.mrf.mxu0 }
 0x10f   :  { %423 = verf.f32 %v180_v24  ;;  %v175_v26 = vadd.f32 %v321_v20, %v174_v25 }
 0x110   :  { %v376_v27 = vpop.f32.mrf.mxu0 }
 0x111   :  { %v181_v28 = vmul.f32 0.70710677, %v175_v26  ;;  %v179_v33 = vmul.f32 0.5, %v175_v26 }
 0x113   :  { %425 = verf.f32 %v181_v28 }
 0x11c   :  { %v424_v29 = vpop.eup %423 }
 0x11d   :  { %v184_v30 = vadd.f32 1.0, %v424_v29 }
 0x11f   :  { %v186_v35 = vmul.f32 %v184_v30, %v178_v32 }
 0x120   :  { %v426_v31 = vpop.eup %425 }
 0x121   :  { %v185_v34 = vadd.f32 1.0, %v426_v31 }
 0x123   :  { %v187_v36 = vmul.f32 %v185_v34, %v179_v33 }
 0x125   :  { %v188_v37 = vpack.c.bf16 %v187_v36, %v186_v35 }
 0x127   :  { %394 = vmatmul.mubr.bf16.vlgmr.msra.gmra.mxu1 %v188_v37 }
 0x1e7   :  { %v294_v39 = vpop.f32.mrf.mxu1 }
 0x1e8   :  { %v295_v40 = vadd.f32 %v330_v38, %v294_v39 }
 0x1e9   :  { %v395_v41 = vpop.f32.mrf.mxu1 }
 0x1ea   :  { %301 = vst [vmem:[#allocation8] sm:$0xff] %v295_v40 }
 0x1eb   :  { %v297_v42 = vpop.f32.mrf.mxu1 }
 0x1ec   :  { %v298_v43 = vadd.f32 %v330_v38, %v297_v42 }
 0x1ed   :  { %v396_v44 = vpop.f32.mrf.mxu1 }
 0x1ee   :  { %302 = vst [vmem:[#allocation8 + $0x8] sm:$0xff] %v298_v43 }
 0x1ef   :  { %498 = shalt.err (!%p495_p5)
}
 0x1f0   :  { %314 = dma.vmem_to_hbm [thread:$0]  %s309_s13, 256, %s582_s5, [#allocation4], %s517_s28, %s517_s28, %s518_s29  }
 0x1f1   :  { %511 = dma.done.wait [#allocation4], 256  }
 0x1f2   :  { %512 = vsyncadd [#allocation4], 4294967040 }
 0x1f3   :  { %318 = vsyncpa [#allocation3], 1 }
 0x1f4   :  { %319 = vsyncpa [#allocation6], 1 }
 0x1f5   :  { %320 = vsyncpa [#allocation4], 1 }

</bundles_post_ra>
